<compile_context>
chip_gen: v5e
topology: v5e:2x2
jax: 0.10.0
libtpu: 0.0.40
codegen_flags: <defaults>
</compile_context>

<pallas_src>
import numpy as np
import jax
import jax.numpy as jnp
from jax.experimental import pallas as pl
from jax.experimental.pallas import tpu as pltpu


def build_tap_masks(H, W):
    """masks[k, p] = 1 iff spatial position p has a valid (ky-1, kx-1) neighbor
    under zero 'same' padding, for k = 3*ky + kx."""
    m = np.zeros((9, H * W), np.float32)
    for ky in range(3):
        for kx in range(3):
            dy, dx = ky - 1, kx - 1
            k = ky * 3 + kx
            for r in range(H):
                for c in range(W):
                    if 0 <= r + dy < H and 0 <= c + dx < W:
                        m[k, r * W + c] = 1.0
    return jnp.asarray(m)


def _make_kernel(H, W, use_proj):
    HW = H * W

    def conv3x3(h, w_mat, b, mask_ref):
        # h: (Ci, HW), w_mat: (Co, 9*Ci), b: (Co, 1), mask_ref: (9, 1, HW)
        taps = []
        for ky in range(3):
            for kx in range(3):
                off = (ky - 1) * W + (kx - 1)          # neighbor offset in flattened HW
                if off == 0:
                    shifted = h
                else:
                    # shifted[ci, p] = h[ci, p + off]  (wrap-around is masked below)
                    shifted = pltpu.roll(h, (-off) % HW, 1)
                taps.append(shifted * mask_ref[ky * 3 + kx])   # (Ci, HW) * (1, HW)
        col = jnp.concatenate(taps, axis=0)                    # (9*Ci, HW), sublane concat
        return jnp.dot(w_mat, col, preferred_element_type=jnp.float32) + b

    def kernel(x_ref, mask_ref, *refs):
        if use_proj:
            (wid_ref, bid_ref, w1_ref, b1_ref, w2_ref, b2_ref,
             w3_ref, b3_ref, w4_ref, b4_ref, out_ref) = refs
        else:
            (w1_ref, b1_ref, w2_ref, b2_ref,
             w3_ref, b3_ref, w4_ref, b4_ref, out_ref) = refs

        x = x_ref[0]                                           # (Cin, HW)

        # identity / 1x1 projection path
        if use_proj:
            idp = jnp.dot(wid_ref[...], x,
                          preferred_element_type=jnp.float32) + bid_ref[...]
        else:
            idp = x

        # residual block
        h = jnp.maximum(x, 0.0)
        h = jnp.dot(w1_ref[...], h,
                    preferred_element_type=jnp.float32) + b1_ref[...]       # 1x1
        h = jnp.maximum(h, 0.0)
        h = conv3x3(h, w2_ref[...], b2_ref[...], mask_ref)                  # 3x3
        h = jnp.maximum(h, 0.0)
        h = conv3x3(h, w3_ref[...], b3_ref[...], mask_ref)                  # 3x3
        h = jnp.maximum(h, 0.0)
        h = conv3x3(h, w4_ref[...], b4_ref[...], mask_ref)                  # 3x3

        out_ref[0] = (idp + h).astype(out_ref.dtype)

    return kernel


def decoder_block_forward(x_nchw, params):
    """x_nchw: (N, Cin, H, W) f32.  params use PyTorch Conv2d weight layout (OIHW)."""
    N, Cin, H, W = x_nchw.shape
    Cout, Chid = params["w4"].shape[0], params["w4"].shape[1]
    HW = H * W
    use_proj = Cin != Cout

    x_flat = x_nchw.reshape(N, Cin, HW).astype(jnp.float32)
    masks = build_tap_masks(H, W).reshape(9, 1, HW)

    def mat3x3(w):  # (Co, Ci, 3, 3) -> (Co, 9*Ci) with column order k*Ci + ci, k=3*ky+kx
        Co, Ci = w.shape[0], w.shape[1]
        return jnp.transpose(w, (0, 2, 3, 1)).reshape(Co, 9 * Ci)

    w1 = params["w1"].reshape(Chid, Cin)
    b1 = params["b1"].reshape(Chid, 1)
    w2 = mat3x3(params["w2"]); b2 = params["b2"].reshape(Chid, 1)
    w3 = mat3x3(params["w3"]); b3 = params["b3"].reshape(Chid, 1)
    w4 = mat3x3(params["w4"]); b4 = params["b4"].reshape(Cout, 1)

    operands = [x_flat, masks]
    in_specs = [
        pl.BlockSpec((1, Cin, HW), lambda n: (n, 0, 0)),
        pl.BlockSpec((9, 1, HW), lambda n: (0, 0, 0)),
    ]
    if use_proj:
        wid = params["wid"].reshape(Cout, Cin)
        bid = params["bid"].reshape(Cout, 1)
        operands += [wid, bid]
        in_specs += [pl.BlockSpec(wid.shape, lambda n: (0, 0)),
                     pl.BlockSpec(bid.shape, lambda n: (0, 0))]
    small = [w1, b1, w2, b2, w3, b3, w4, b4]
    operands += small
    in_specs += [pl.BlockSpec(a.shape, lambda n: (0, 0)) for a in small]

    flops = 2 * N * HW * (Cin * Chid            # 1x1
                          + 2 * 9 * Chid * Chid  # two hidden 3x3
                          + 9 * Chid * Cout      # last 3x3
                          + (Cin * Cout if use_proj else 0))
    bytes_accessed = 4 * (x_flat.size + N * HW * Cout
                          + sum(int(np.prod(o.shape)) for o in operands[1:]))

    out_flat = pl.pallas_call(
        _make_kernel(H, W, use_proj),
        out_shape=jax.ShapeDtypeStruct((N, Cout, HW), jnp.float32),
        grid=(N,),
        in_specs=in_specs,
        out_specs=pl.BlockSpec((1, Cout, HW), lambda n: (n, 0, 0)),
        compiler_params=pltpu.CompilerParams(
            dimension_semantics=("parallel",),
            vmem_limit_bytes=32 * 1024 * 1024),
        cost_estimate=pl.CostEstimate(flops=int(flops), transcendentals=0,
                                      bytes_accessed=int(bytes_accessed)),
    )(*operands)

    return out_flat.reshape(N, Cout, H, W)


def decoder_block_reference(x, params):
    """Pure-JAX NCHW reference matching the PyTorch forward."""
    def conv(h, w, b, pad):
        o = jax.lax.conv_general_dilated(
            h, w, window_strides=(1, 1), padding=[(pad, pad), (pad, pad)],
            dimension_numbers=("NCHW", "OIHW", "NCHW"))
        return o + b.reshape(1, -1, 1, 1)

    if "wid" in params:
        idp = conv(x, params["wid"], params["bid"], 0)
    else:
        idp = x
    h = jax.nn.relu(x)
    h = conv(h, params["w1"], params["b1"], 0)
    h = jax.nn.relu(h)
    h = conv(h, params["w2"], params["b2"], 1)
    h = jax.nn.relu(h)
    h = conv(h, params["w3"], params["b3"], 1)
    h = jax.nn.relu(h)
    h = conv(h, params["w4"], params["b4"], 1)
    return idp + h


if __name__ == "__main__":
    # dim_in != dim_out -> id_path is a 1x1 conv projection.
    N, Cin, Cout, H, W = 2, 4, 32, 16, 16
    Chid = Cout // 4

    keys = jax.random.split(jax.random.PRNGKey(0), 11)
    params = {
        "wid": jax.random.normal(keys[0], (Cout, Cin, 1, 1), jnp.float32) * 0.1,
        "bid": jax.random.normal(keys[1], (Cout,), jnp.float32) * 0.05,
        "w1":  jax.random.normal(keys[2], (Chid, Cin, 1, 1), jnp.float32) * 0.1,
        "b1":  jax.random.normal(keys[3], (Chid,), jnp.float32) * 0.05,
        "w2":  jax.random.normal(keys[4], (Chid, Chid, 3, 3), jnp.float32) * 0.1,
        "b2":  jax.random.normal(keys[5], (Chid,), jnp.float32) * 0.05,
        "w3":  jax.random.normal(keys[6], (Chid, Chid, 3, 3), jnp.float32) * 0.1,
        "b3":  jax.random.normal(keys[7], (Chid,), jnp.float32) * 0.05,
        "w4":  jax.random.normal(keys[8], (Cout, Chid, 3, 3), jnp.float32) * 0.1,
        "b4":  jax.random.normal(keys[9], (Cout,), jnp.float32) * 0.05,
    }
    x = jax.random.normal(keys[10], (N, Cin, H, W), jnp.float32)

    out = decoder_block_forward(x, params)
    out = jax.block_until_ready(out)

    ref = decoder_block_reference(x, params)
    np.testing.assert_allclose(np.asarray(out), np.asarray(ref), rtol=2e-4, atol=2e-4)

    print("KERNEL_OK")
</pallas_src>

<mosaic_0001>
module attributes {stable_mosaic.version = 11 : i64} {
  func.func @kernel(%arg0: i32, %arg1: memref<1x4x256xf32, #tpu.memory_space<vmem>>, %arg2: memref<9x1x256xf32, #tpu.memory_space<vmem>>, %arg3: memref<32x4xf32, #tpu.memory_space<vmem>>, %arg4: memref<32x1xf32, #tpu.memory_space<vmem>>, %arg5: memref<8x4xf32, #tpu.memory_space<vmem>>, %arg6: memref<8x1xf32, #tpu.memory_space<vmem>>, %arg7: memref<8x72xf32, #tpu.memory_space<vmem>>, %arg8: memref<8x1xf32, #tpu.memory_space<vmem>>, %arg9: memref<8x72xf32, #tpu.memory_space<vmem>>, %arg10: memref<8x1xf32, #tpu.memory_space<vmem>>, %arg11: memref<32x72xf32, #tpu.memory_space<vmem>>, %arg12: memref<32x1xf32, #tpu.memory_space<vmem>>, %arg13: memref<1x32x256xf32, #tpu.memory_space<vmem>>) attributes {dimension_semantics = [#tpu.dimension_semantics<parallel>], iteration_bounds = array<i64: 2>, scalar_prefetch = 0 : i64, scratch_operands = 0 : i64, tpu.core_type = #tpu.core_type<tc>, window_params = [{transform_indices = @transform_0, window_bounds = array<i64: 1, 4, 256>}, {pipeline_mode = #tpu.pipeline_mode<synchronous>, transform_indices = @transform_1, window_bounds = array<i64: 9, 1, 256>}, {pipeline_mode = #tpu.pipeline_mode<synchronous>, transform_indices = @transform_2, window_bounds = array<i64: 32, 4>}, {pipeline_mode = #tpu.pipeline_mode<synchronous>, transform_indices = @transform_3, window_bounds = array<i64: 32, 1>}, {pipeline_mode = #tpu.pipeline_mode<synchronous>, transform_indices = @transform_4, window_bounds = array<i64: 8, 4>}, {pipeline_mode = #tpu.pipeline_mode<synchronous>, transform_indices = @transform_5, window_bounds = array<i64: 8, 1>}, {pipeline_mode = #tpu.pipeline_mode<synchronous>, transform_indices = @transform_6, window_bounds = array<i64: 8, 72>}, {pipeline_mode = #tpu.pipeline_mode<synchronous>, transform_indices = @transform_7, window_bounds = array<i64: 8, 1>}, {pipeline_mode = #tpu.pipeline_mode<synchronous>, transform_indices = @transform_8, window_bounds = array<i64: 8, 72>}, {pipeline_mode = #tpu.pipeline_mode<synchronous>, transform_indices = @transform_9, window_bounds = array<i64: 8, 1>}, {pipeline_mode = #tpu.pipeline_mode<synchronous>, transform_indices = @transform_10, window_bounds = array<i64: 32, 72>}, {pipeline_mode = #tpu.pipeline_mode<synchronous>, transform_indices = @transform_11, window_bounds = array<i64: 32, 1>}, {transform_indices = @transform_12, window_bounds = array<i64: 1, 32, 256>}]} {
    %c0 = arith.constant 0 : index
    %c0_0 = arith.constant 0 : index
    %c0_1 = arith.constant 0 : index
    %0 = vector.load %arg1[%c0, %c0_0, %c0_1] : memref<1x4x256xf32, #tpu.memory_space<vmem>>, vector<1x4x256xf32>
    %1 = vector.shape_cast %0 : vector<1x4x256xf32> to vector<4x256xf32>
    %c0_2 = arith.constant 0 : index
    %c0_3 = arith.constant 0 : index
    %2 = vector.load %arg3[%c0_2, %c0_3] : memref<32x4xf32, #tpu.memory_space<vmem>>, vector<32x4xf32>
    %cst = arith.constant dense<0.000000e+00> : vector<32x256xf32>
    %3 = tpu.matmul %2, %1, %cst {dimension_numbers = #tpu.dot_dimension_numbers<[1], [0], [0], [1], [0, 0, 1, 1], [], []>} : vector<32x4xf32>, vector<4x256xf32>, vector<32x256xf32> -> vector<32x256xf32>
    %c0_4 = arith.constant 0 : index
    %c0_5 = arith.constant 0 : index
    %4 = vector.load %arg4[%c0_4, %c0_5] : memref<32x1xf32, #tpu.memory_space<vmem>>, vector<32x1xf32>
    %5 = vector.broadcast %4 : vector<32x1xf32> to vector<32x256xf32>
    %6 = arith.addf %3, %5 : vector<32x256xf32>
    %cst_6 = arith.constant 0.000000e+00 : f32
    %7 = vector.broadcast %cst_6 : f32 to vector<4x256xf32>
    %8 = arith.maximumf %1, %7 : vector<4x256xf32>
    %c0_7 = arith.constant 0 : index
    %c0_8 = arith.constant 0 : index
    %9 = vector.load %arg5[%c0_7, %c0_8] : memref<8x4xf32, #tpu.memory_space<vmem>>, vector<8x4xf32>
    %cst_9 = arith.constant dense<0.000000e+00> : vector<8x256xf32>
    %10 = tpu.matmul %9, %8, %cst_9 {dimension_numbers = #tpu.dot_dimension_numbers<[1], [0], [0], [1], [0, 0, 1, 1], [], []>} : vector<8x4xf32>, vector<4x256xf32>, vector<8x256xf32> -> vector<8x256xf32>
    %c0_10 = arith.constant 0 : index
    %c0_11 = arith.constant 0 : index
    %11 = vector.load %arg6[%c0_10, %c0_11] : memref<8x1xf32, #tpu.memory_space<vmem>>, vector<8x1xf32>
    %12 = vector.broadcast %11 : vector<8x1xf32> to vector<8x256xf32>
    %13 = arith.addf %10, %12 : vector<8x256xf32>
    %cst_12 = arith.constant 0.000000e+00 : f32
    %14 = vector.broadcast %cst_12 : f32 to vector<8x256xf32>
    %15 = arith.maximumf %13, %14 : vector<8x256xf32>
    %c0_13 = arith.constant 0 : index
    %c0_14 = arith.constant 0 : index
    %16 = vector.load %arg7[%c0_13, %c0_14] : memref<8x72xf32, #tpu.memory_space<vmem>>, vector<8x72xf32>
    %c0_15 = arith.constant 0 : index
    %c0_16 = arith.constant 0 : index
    %17 = vector.load %arg8[%c0_15, %c0_16] : memref<8x1xf32, #tpu.memory_space<vmem>>, vector<8x1xf32>
    %c17_i32 = arith.constant 17 : i32
    %18 = tpu.dynamic_rotate %15 by %c17_i32 dim 1 : vector<8x256xf32>, i32 -> vector<8x256xf32>
    %c0_17 = arith.constant 0 : index
    %c0_18 = arith.constant 0 : index
    %c0_19 = arith.constant 0 : index
    %19 = vector.load %arg2[%c0_17, %c0_18, %c0_19] : memref<9x1x256xf32, #tpu.memory_space<vmem>>, vector<1x1x256xf32>
    %20 = vector.shape_cast %19 : vector<1x1x256xf32> to vector<1x256xf32>
    %21 = vector.broadcast %20 : vector<1x256xf32> to vector<8x256xf32>
    %22 = arith.mulf %18, %21 : vector<8x256xf32>
    %c16_i32 = arith.constant 16 : i32
    %23 = tpu.dynamic_rotate %15 by %c16_i32 dim 1 : vector<8x256xf32>, i32 -> vector<8x256xf32>
    %c1 = arith.constant 1 : index
    %c0_20 = arith.constant 0 : index
    %c0_21 = arith.constant 0 : index
    %24 = vector.load %arg2[%c1, %c0_20, %c0_21] : memref<9x1x256xf32, #tpu.memory_space<vmem>>, vector<1x1x256xf32>
    %25 = vector.shape_cast %24 : vector<1x1x256xf32> to vector<1x256xf32>
    %26 = vector.broadcast %25 : vector<1x256xf32> to vector<8x256xf32>
    %27 = arith.mulf %23, %26 : vector<8x256xf32>
    %c15_i32 = arith.constant 15 : i32
    %28 = tpu.dynamic_rotate %15 by %c15_i32 dim 1 : vector<8x256xf32>, i32 -> vector<8x256xf32>
    %c2 = arith.constant 2 : index
    %c0_22 = arith.constant 0 : index
    %c0_23 = arith.constant 0 : index
    %29 = vector.load %arg2[%c2, %c0_22, %c0_23] : memref<9x1x256xf32, #tpu.memory_space<vmem>>, vector<1x1x256xf32>
    %30 = vector.shape_cast %29 : vector<1x1x256xf32> to vector<1x256xf32>
    %31 = vector.broadcast %30 : vector<1x256xf32> to vector<8x256xf32>
    %32 = arith.mulf %28, %31 : vector<8x256xf32>
    %c1_i32 = arith.constant 1 : i32
    %33 = tpu.dynamic_rotate %15 by %c1_i32 dim 1 : vector<8x256xf32>, i32 -> vector<8x256xf32>
    %c3 = arith.constant 3 : index
    %c0_24 = arith.constant 0 : index
    %c0_25 = arith.constant 0 : index
    %34 = vector.load %arg2[%c3, %c0_24, %c0_25] : memref<9x1x256xf32, #tpu.memory_space<vmem>>, vector<1x1x256xf32>
    %35 = vector.shape_cast %34 : vector<1x1x256xf32> to vector<1x256xf32>
    %36 = vector.broadcast %35 : vector<1x256xf32> to vector<8x256xf32>
    %37 = arith.mulf %33, %36 : vector<8x256xf32>
    %c4 = arith.constant 4 : index
    %c0_26 = arith.constant 0 : index
    %c0_27 = arith.constant 0 : index
    %38 = vector.load %arg2[%c4, %c0_26, %c0_27] : memref<9x1x256xf32, #tpu.memory_space<vmem>>, vector<1x1x256xf32>
    %39 = vector.shape_cast %38 : vector<1x1x256xf32> to vector<1x256xf32>
    %40 = vector.broadcast %39 : vector<1x256xf32> to vector<8x256xf32>
    %41 = arith.mulf %15, %40 : vector<8x256xf32>
    %c255_i32 = arith.constant 255 : i32
    %42 = tpu.dynamic_rotate %15 by %c255_i32 dim 1 : vector<8x256xf32>, i32 -> vector<8x256xf32>
    %c5 = arith.constant 5 : index
    %c0_28 = arith.constant 0 : index
    %c0_29 = arith.constant 0 : index
    %43 = vector.load %arg2[%c5, %c0_28, %c0_29] : memref<9x1x256xf32, #tpu.memory_space<vmem>>, vector<1x1x256xf32>
    %44 = vector.shape_cast %43 : vector<1x1x256xf32> to vector<1x256xf32>
    %45 = vector.broadcast %44 : vector<1x256xf32> to vector<8x256xf32>
    %46 = arith.mulf %42, %45 : vector<8x256xf32>
    %c241_i32 = arith.constant 241 : i32
    %47 = tpu.dynamic_rotate %15 by %c241_i32 dim 1 : vector<8x256xf32>, i32 -> vector<8x256xf32>
    %c6 = arith.constant 6 : index
    %c0_30 = arith.constant 0 : index
    %c0_31 = arith.constant 0 : index
    %48 = vector.load %arg2[%c6, %c0_30, %c0_31] : memref<9x1x256xf32, #tpu.memory_space<vmem>>, vector<1x1x256xf32>
    %49 = vector.shape_cast %48 : vector<1x1x256xf32> to vector<1x256xf32>
    %50 = vector.broadcast %49 : vector<1x256xf32> to vector<8x256xf32>
    %51 = arith.mulf %47, %50 : vector<8x256xf32>
    %c240_i32 = arith.constant 240 : i32
    %52 = tpu.dynamic_rotate %15 by %c240_i32 dim 1 : vector<8x256xf32>, i32 -> vector<8x256xf32>
    %c7 = arith.constant 7 : index
    %c0_32 = arith.constant 0 : index
    %c0_33 = arith.constant 0 : index
    %53 = vector.load %arg2[%c7, %c0_32, %c0_33] : memref<9x1x256xf32, #tpu.memory_space<vmem>>, vector<1x1x256xf32>
    %54 = vector.shape_cast %53 : vector<1x1x256xf32> to vector<1x256xf32>
    %55 = vector.broadcast %54 : vector<1x256xf32> to vector<8x256xf32>
    %56 = arith.mulf %52, %55 : vector<8x256xf32>
    %c239_i32 = arith.constant 239 : i32
    %57 = tpu.dynamic_rotate %15 by %c239_i32 dim 1 : vector<8x256xf32>, i32 -> vector<8x256xf32>
    %c8 = arith.constant 8 : index
    %c0_34 = arith.constant 0 : index
    %c0_35 = arith.constant 0 : index
    %58 = vector.load %arg2[%c8, %c0_34, %c0_35] : memref<9x1x256xf32, #tpu.memory_space<vmem>>, vector<1x1x256xf32>
    %59 = vector.shape_cast %58 : vector<1x1x256xf32> to vector<1x256xf32>
    %60 = vector.broadcast %59 : vector<1x256xf32> to vector<8x256xf32>
    %61 = arith.mulf %57, %60 : vector<8x256xf32>
    %62 = tpu.concatenate %22, %27, %32, %37, %41, %46, %51, %56, %61 in 0 : vector<8x256xf32>, vector<8x256xf32>, vector<8x256xf32>, vector<8x256xf32>, vector<8x256xf32>, vector<8x256xf32>, vector<8x256xf32>, vector<8x256xf32>, vector<8x256xf32> -> vector<72x256xf32>
    %cst_36 = arith.constant dense<0.000000e+00> : vector<8x256xf32>
    %63 = tpu.matmul %16, %62, %cst_36 {dimension_numbers = #tpu.dot_dimension_numbers<[1], [0], [0], [1], [0, 0, 1, 1], [], []>} : vector<8x72xf32>, vector<72x256xf32>, vector<8x256xf32> -> vector<8x256xf32>
    %64 = vector.broadcast %17 : vector<8x1xf32> to vector<8x256xf32>
    %65 = arith.addf %63, %64 : vector<8x256xf32>
    %cst_37 = arith.constant 0.000000e+00 : f32
    %66 = vector.broadcast %cst_37 : f32 to vector<8x256xf32>
    %67 = arith.maximumf %65, %66 : vector<8x256xf32>
    %c0_38 = arith.constant 0 : index
    %c0_39 = arith.constant 0 : index
    %68 = vector.load %arg9[%c0_38, %c0_39] : memref<8x72xf32, #tpu.memory_space<vmem>>, vector<8x72xf32>
    %c0_40 = arith.constant 0 : index
    %c0_41 = arith.constant 0 : index
    %69 = vector.load %arg10[%c0_40, %c0_41] : memref<8x1xf32, #tpu.memory_space<vmem>>, vector<8x1xf32>
    %c17_i32_42 = arith.constant 17 : i32
    %70 = tpu.dynamic_rotate %67 by %c17_i32_42 dim 1 : vector<8x256xf32>, i32 -> vector<8x256xf32>
    %c0_43 = arith.constant 0 : index
    %c0_44 = arith.constant 0 : index
    %c0_45 = arith.constant 0 : index
    %71 = vector.load %arg2[%c0_43, %c0_44, %c0_45] : memref<9x1x256xf32, #tpu.memory_space<vmem>>, vector<1x1x256xf32>
    %72 = vector.shape_cast %71 : vector<1x1x256xf32> to vector<1x256xf32>
    %73 = vector.broadcast %72 : vector<1x256xf32> to vector<8x256xf32>
    %74 = arith.mulf %70, %73 : vector<8x256xf32>
    %c16_i32_46 = arith.constant 16 : i32
    %75 = tpu.dynamic_rotate %67 by %c16_i32_46 dim 1 : vector<8x256xf32>, i32 -> vector<8x256xf32>
    %c1_47 = arith.constant 1 : index
    %c0_48 = arith.constant 0 : index
    %c0_49 = arith.constant 0 : index
    %76 = vector.load %arg2[%c1_47, %c0_48, %c0_49] : memref<9x1x256xf32, #tpu.memory_space<vmem>>, vector<1x1x256xf32>
    %77 = vector.shape_cast %76 : vector<1x1x256xf32> to vector<1x256xf32>
    %78 = vector.broadcast %77 : vector<1x256xf32> to vector<8x256xf32>
    %79 = arith.mulf %75, %78 : vector<8x256xf32>
    %c15_i32_50 = arith.constant 15 : i32
    %80 = tpu.dynamic_rotate %67 by %c15_i32_50 dim 1 : vector<8x256xf32>, i32 -> vector<8x256xf32>
    %c2_51 = arith.constant 2 : index
    %c0_52 = arith.constant 0 : index
    %c0_53 = arith.constant 0 : index
    %81 = vector.load %arg2[%c2_51, %c0_52, %c0_53] : memref<9x1x256xf32, #tpu.memory_space<vmem>>, vector<1x1x256xf32>
    %82 = vector.shape_cast %81 : vector<1x1x256xf32> to vector<1x256xf32>
    %83 = vector.broadcast %82 : vector<1x256xf32> to vector<8x256xf32>
    %84 = arith.mulf %80, %83 : vector<8x256xf32>
    %c1_i32_54 = arith.constant 1 : i32
    %85 = tpu.dynamic_rotate %67 by %c1_i32_54 dim 1 : vector<8x256xf32>, i32 -> vector<8x256xf32>
    %c3_55 = arith.constant 3 : index
    %c0_56 = arith.constant 0 : index
    %c0_57 = arith.constant 0 : index
    %86 = vector.load %arg2[%c3_55, %c0_56, %c0_57] : memref<9x1x256xf32, #tpu.memory_space<vmem>>, vector<1x1x256xf32>
    %87 = vector.shape_cast %86 : vector<1x1x256xf32> to vector<1x256xf32>
    %88 = vector.broadcast %87 : vector<1x256xf32> to vector<8x256xf32>
    %89 = arith.mulf %85, %88 : vector<8x256xf32>
    %c4_58 = arith.constant 4 : index
    %c0_59 = arith.constant 0 : index
    %c0_60 = arith.constant 0 : index
    %90 = vector.load %arg2[%c4_58, %c0_59, %c0_60] : memref<9x1x256xf32, #tpu.memory_space<vmem>>, vector<1x1x256xf32>
    %91 = vector.shape_cast %90 : vector<1x1x256xf32> to vector<1x256xf32>
    %92 = vector.broadcast %91 : vector<1x256xf32> to vector<8x256xf32>
    %93 = arith.mulf %67, %92 : vector<8x256xf32>
    %c255_i32_61 = arith.constant 255 : i32
    %94 = tpu.dynamic_rotate %67 by %c255_i32_61 dim 1 : vector<8x256xf32>, i32 -> vector<8x256xf32>
    %c5_62 = arith.constant 5 : index
    %c0_63 = arith.constant 0 : index
    %c0_64 = arith.constant 0 : index
    %95 = vector.load %arg2[%c5_62, %c0_63, %c0_64] : memref<9x1x256xf32, #tpu.memory_space<vmem>>, vector<1x1x256xf32>
    %96 = vector.shape_cast %95 : vector<1x1x256xf32> to vector<1x256xf32>
    %97 = vector.broadcast %96 : vector<1x256xf32> to vector<8x256xf32>
    %98 = arith.mulf %94, %97 : vector<8x256xf32>
    %c241_i32_65 = arith.constant 241 : i32
    %99 = tpu.dynamic_rotate %67 by %c241_i32_65 dim 1 : vector<8x256xf32>, i32 -> vector<8x256xf32>
    %c6_66 = arith.constant 6 : index
    %c0_67 = arith.constant 0 : index
    %c0_68 = arith.constant 0 : index
    %100 = vector.load %arg2[%c6_66, %c0_67, %c0_68] : memref<9x1x256xf32, #tpu.memory_space<vmem>>, vector<1x1x256xf32>
    %101 = vector.shape_cast %100 : vector<1x1x256xf32> to vector<1x256xf32>
    %102 = vector.broadcast %101 : vector<1x256xf32> to vector<8x256xf32>
    %103 = arith.mulf %99, %102 : vector<8x256xf32>
    %c240_i32_69 = arith.constant 240 : i32
    %104 = tpu.dynamic_rotate %67 by %c240_i32_69 dim 1 : vector<8x256xf32>, i32 -> vector<8x256xf32>
    %c7_70 = arith.constant 7 : index
    %c0_71 = arith.constant 0 : index
    %c0_72 = arith.constant 0 : index
    %105 = vector.load %arg2[%c7_70, %c0_71, %c0_72] : memref<9x1x256xf32, #tpu.memory_space<vmem>>, vector<1x1x256xf32>
    %106 = vector.shape_cast %105 : vector<1x1x256xf32> to vector<1x256xf32>
    %107 = vector.broadcast %106 : vector<1x256xf32> to vector<8x256xf32>
    %108 = arith.mulf %104, %107 : vector<8x256xf32>
    %c239_i32_73 = arith.constant 239 : i32
    %109 = tpu.dynamic_rotate %67 by %c239_i32_73 dim 1 : vector<8x256xf32>, i32 -> vector<8x256xf32>
    %c8_74 = arith.constant 8 : index
    %c0_75 = arith.constant 0 : index
    %c0_76 = arith.constant 0 : index
    %110 = vector.load %arg2[%c8_74, %c0_75, %c0_76] : memref<9x1x256xf32, #tpu.memory_space<vmem>>, vector<1x1x256xf32>
    %111 = vector.shape_cast %110 : vector<1x1x256xf32> to vector<1x256xf32>
    %112 = vector.broadcast %111 : vector<1x256xf32> to vector<8x256xf32>
    %113 = arith.mulf %109, %112 : vector<8x256xf32>
    %114 = tpu.concatenate %74, %79, %84, %89, %93, %98, %103, %108, %113 in 0 : vector<8x256xf32>, vector<8x256xf32>, vector<8x256xf32>, vector<8x256xf32>, vector<8x256xf32>, vector<8x256xf32>, vector<8x256xf32>, vector<8x256xf32>, vector<8x256xf32> -> vector<72x256xf32>
    %cst_77 = arith.constant dense<0.000000e+00> : vector<8x256xf32>
    %115 = tpu.matmul %68, %114, %cst_77 {dimension_numbers = #tpu.dot_dimension_numbers<[1], [0], [0], [1], [0, 0, 1, 1], [], []>} : vector<8x72xf32>, vector<72x256xf32>, vector<8x256xf32> -> vector<8x256xf32>
    %116 = vector.broadcast %69 : vector<8x1xf32> to vector<8x256xf32>
    %117 = arith.addf %115, %116 : vector<8x256xf32>
    %cst_78 = arith.constant 0.000000e+00 : f32
    %118 = vector.broadcast %cst_78 : f32 to vector<8x256xf32>
    %119 = arith.maximumf %117, %118 : vector<8x256xf32>
    %c0_79 = arith.constant 0 : index
    %c0_80 = arith.constant 0 : index
    %120 = vector.load %arg11[%c0_79, %c0_80] : memref<32x72xf32, #tpu.memory_space<vmem>>, vector<32x72xf32>
    %c0_81 = arith.constant 0 : index
    %c0_82 = arith.constant 0 : index
    %121 = vector.load %arg12[%c0_81, %c0_82] : memref<32x1xf32, #tpu.memory_space<vmem>>, vector<32x1xf32>
    %c17_i32_83 = arith.constant 17 : i32
    %122 = tpu.dynamic_rotate %119 by %c17_i32_83 dim 1 : vector<8x256xf32>, i32 -> vector<8x256xf32>
    %c0_84 = arith.constant 0 : index
    %c0_85 = arith.constant 0 : index
    %c0_86 = arith.constant 0 : index
    %123 = vector.load %arg2[%c0_84, %c0_85, %c0_86] : memref<9x1x256xf32, #tpu.memory_space<vmem>>, vector<1x1x256xf32>
    %124 = vector.shape_cast %123 : vector<1x1x256xf32> to vector<1x256xf32>
    %125 = vector.broadcast %124 : vector<1x256xf32> to vector<8x256xf32>
    %126 = arith.mulf %122, %125 : vector<8x256xf32>
    %c16_i32_87 = arith.constant 16 : i32
    %127 = tpu.dynamic_rotate %119 by %c16_i32_87 dim 1 : vector<8x256xf32>, i32 -> vector<8x256xf32>
    %c1_88 = arith.constant 1 : index
    %c0_89 = arith.constant 0 : index
    %c0_90 = arith.constant 0 : index
    %128 = vector.load %arg2[%c1_88, %c0_89, %c0_90] : memref<9x1x256xf32, #tpu.memory_space<vmem>>, vector<1x1x256xf32>
    %129 = vector.shape_cast %128 : vector<1x1x256xf32> to vector<1x256xf32>
    %130 = vector.broadcast %129 : vector<1x256xf32> to vector<8x256xf32>
    %131 = arith.mulf %127, %130 : vector<8x256xf32>
    %c15_i32_91 = arith.constant 15 : i32
    %132 = tpu.dynamic_rotate %119 by %c15_i32_91 dim 1 : vector<8x256xf32>, i32 -> vector<8x256xf32>
    %c2_92 = arith.constant 2 : index
    %c0_93 = arith.constant 0 : index
    %c0_94 = arith.constant 0 : index
    %133 = vector.load %arg2[%c2_92, %c0_93, %c0_94] : memref<9x1x256xf32, #tpu.memory_space<vmem>>, vector<1x1x256xf32>
    %134 = vector.shape_cast %133 : vector<1x1x256xf32> to vector<1x256xf32>
    %135 = vector.broadcast %134 : vector<1x256xf32> to vector<8x256xf32>
    %136 = arith.mulf %132, %135 : vector<8x256xf32>
    %c1_i32_95 = arith.constant 1 : i32
    %137 = tpu.dynamic_rotate %119 by %c1_i32_95 dim 1 : vector<8x256xf32>, i32 -> vector<8x256xf32>
    %c3_96 = arith.constant 3 : index
    %c0_97 = arith.constant 0 : index
    %c0_98 = arith.constant 0 : index
    %138 = vector.load %arg2[%c3_96, %c0_97, %c0_98] : memref<9x1x256xf32, #tpu.memory_space<vmem>>, vector<1x1x256xf32>
    %139 = vector.shape_cast %138 : vector<1x1x256xf32> to vector<1x256xf32>
    %140 = vector.broadcast %139 : vector<1x256xf32> to vector<8x256xf32>
    %141 = arith.mulf %137, %140 : vector<8x256xf32>
    %c4_99 = arith.constant 4 : index
    %c0_100 = arith.constant 0 : index
    %c0_101 = arith.constant 0 : index
    %142 = vector.load %arg2[%c4_99, %c0_100, %c0_101] : memref<9x1x256xf32, #tpu.memory_space<vmem>>, vector<1x1x256xf32>
    %143 = vector.shape_cast %142 : vector<1x1x256xf32> to vector<1x256xf32>
    %144 = vector.broadcast %143 : vector<1x256xf32> to vector<8x256xf32>
    %145 = arith.mulf %119, %144 : vector<8x256xf32>
    %c255_i32_102 = arith.constant 255 : i32
    %146 = tpu.dynamic_rotate %119 by %c255_i32_102 dim 1 : vector<8x256xf32>, i32 -> vector<8x256xf32>
    %c5_103 = arith.constant 5 : index
    %c0_104 = arith.constant 0 : index
    %c0_105 = arith.constant 0 : index
    %147 = vector.load %arg2[%c5_103, %c0_104, %c0_105] : memref<9x1x256xf32, #tpu.memory_space<vmem>>, vector<1x1x256xf32>
    %148 = vector.shape_cast %147 : vector<1x1x256xf32> to vector<1x256xf32>
    %149 = vector.broadcast %148 : vector<1x256xf32> to vector<8x256xf32>
    %150 = arith.mulf %146, %149 : vector<8x256xf32>
    %c241_i32_106 = arith.constant 241 : i32
    %151 = tpu.dynamic_rotate %119 by %c241_i32_106 dim 1 : vector<8x256xf32>, i32 -> vector<8x256xf32>
    %c6_107 = arith.constant 6 : index
    %c0_108 = arith.constant 0 : index
    %c0_109 = arith.constant 0 : index
    %152 = vector.load %arg2[%c6_107, %c0_108, %c0_109] : memref<9x1x256xf32, #tpu.memory_space<vmem>>, vector<1x1x256xf32>
    %153 = vector.shape_cast %152 : vector<1x1x256xf32> to vector<1x256xf32>
    %154 = vector.broadcast %153 : vector<1x256xf32> to vector<8x256xf32>
    %155 = arith.mulf %151, %154 : vector<8x256xf32>
    %c240_i32_110 = arith.constant 240 : i32
    %156 = tpu.dynamic_rotate %119 by %c240_i32_110 dim 1 : vector<8x256xf32>, i32 -> vector<8x256xf32>
    %c7_111 = arith.constant 7 : index
    %c0_112 = arith.constant 0 : index
    %c0_113 = arith.constant 0 : index
    %157 = vector.load %arg2[%c7_111, %c0_112, %c0_113] : memref<9x1x256xf32, #tpu.memory_space<vmem>>, vector<1x1x256xf32>
    %158 = vector.shape_cast %157 : vector<1x1x256xf32> to vector<1x256xf32>
    %159 = vector.broadcast %158 : vector<1x256xf32> to vector<8x256xf32>
    %160 = arith.mulf %156, %159 : vector<8x256xf32>
    %c239_i32_114 = arith.constant 239 : i32
    %161 = tpu.dynamic_rotate %119 by %c239_i32_114 dim 1 : vector<8x256xf32>, i32 -> vector<8x256xf32>
    %c8_115 = arith.constant 8 : index
    %c0_116 = arith.constant 0 : index
    %c0_117 = arith.constant 0 : index
    %162 = vector.load %arg2[%c8_115, %c0_116, %c0_117] : memref<9x1x256xf32, #tpu.memory_space<vmem>>, vector<1x1x256xf32>
    %163 = vector.shape_cast %162 : vector<1x1x256xf32> to vector<1x256xf32>
    %164 = vector.broadcast %163 : vector<1x256xf32> to vector<8x256xf32>
    %165 = arith.mulf %161, %164 : vector<8x256xf32>
    %166 = tpu.concatenate %126, %131, %136, %141, %145, %150, %155, %160, %165 in 0 : vector<8x256xf32>, vector<8x256xf32>, vector<8x256xf32>, vector<8x256xf32>, vector<8x256xf32>, vector<8x256xf32>, vector<8x256xf32>, vector<8x256xf32>, vector<8x256xf32> -> vector<72x256xf32>
    %cst_118 = arith.constant dense<0.000000e+00> : vector<32x256xf32>
    %167 = tpu.matmul %120, %166, %cst_118 {dimension_numbers = #tpu.dot_dimension_numbers<[1], [0], [0], [1], [0, 0, 1, 1], [], []>} : vector<32x72xf32>, vector<72x256xf32>, vector<32x256xf32> -> vector<32x256xf32>
    %168 = vector.broadcast %121 : vector<32x1xf32> to vector<32x256xf32>
    %169 = arith.addf %167, %168 : vector<32x256xf32>
    %170 = arith.addf %6, %169 : vector<32x256xf32>
    %c0_119 = arith.constant 0 : index
    %c0_120 = arith.constant 0 : index
    %c0_121 = arith.constant 0 : index
    %171 = vector.load %arg13[%c0_119, %c0_120, %c0_121] : memref<1x32x256xf32, #tpu.memory_space<vmem>>, vector<1x32x256xf32>
    %172 = vector.shape_cast %171 : vector<1x32x256xf32> to vector<32x256xf32>
    %173 = vector.shape_cast %170 : vector<32x256xf32> to vector<1x32x256xf32>
    tpu.vector_store %arg13[%c0_119, %c0_120, %c0_121], %173 {strides = array<i32>} : memref<1x32x256xf32, #tpu.memory_space<vmem>>, vector<1x32x256xf32>,
    return
  }
  func.func @transform_0(%arg0: i32) -> (i32, i32, i32) {
    %c0_i32 = arith.constant 0 : i32
    %c0_i32_0 = arith.constant 0 : i32
    %c0_i32_1 = arith.constant 0 : i32
    return %arg0, %c0_i32, %c0_i32_0 : i32, i32, i32
  }
  func.func @transform_1(%arg0: i32) -> (i32, i32, i32) {
    %c0_i32 = arith.constant 0 : i32
    %c0_i32_0 = arith.constant 0 : i32
    %c0_i32_1 = arith.constant 0 : i32
    %c0_i32_2 = arith.constant 0 : i32
    return %c0_i32, %c0_i32_0, %c0_i32_1 : i32, i32, i32
  }
  func.func @transform_2(%arg0: i32) -> (i32, i32) {
    %c0_i32 = arith.constant 0 : i32
    %c0_i32_0 = arith.constant 0 : i32
    %c0_i32_1 = arith.constant 0 : i32
    return %c0_i32, %c0_i32_0 : i32, i32
  }
  func.func @transform_3(%arg0: i32) -> (i32, i32) {
    %c0_i32 = arith.constant 0 : i32
    %c0_i32_0 = arith.constant 0 : i32
    %c0_i32_1 = arith.constant 0 : i32
    return %c0_i32, %c0_i32_0 : i32, i32
  }
  func.func @transform_4(%arg0: i32) -> (i32, i32) {
    %c0_i32 = arith.constant 0 : i32
    %c0_i32_0 = arith.constant 0 : i32
    %c0_i32_1 = arith.constant 0 : i32
    return %c0_i32, %c0_i32_0 : i32, i32
  }
  func.func @transform_5(%arg0: i32) -> (i32, i32) {
    %c0_i32 = arith.constant 0 : i32
    %c0_i32_0 = arith.constant 0 : i32
    %c0_i32_1 = arith.constant 0 : i32
    return %c0_i32, %c0_i32_0 : i32, i32
  }
  func.func @transform_6(%arg0: i32) -> (i32, i32) {
    %c0_i32 = arith.constant 0 : i32
    %c0_i32_0 = arith.constant 0 : i32
    %c0_i32_1 = arith.constant 0 : i32
    return %c0_i32, %c0_i32_0 : i32, i32
  }
  func.func @transform_7(%arg0: i32) -> (i32, i32) {
    %c0_i32 = arith.constant 0 : i32
    %c0_i32_0 = arith.constant 0 : i32
    %c0_i32_1 = arith.constant 0 : i32
    return %c0_i32, %c0_i32_0 : i32, i32
  }
  func.func @transform_8(%arg0: i32) -> (i32, i32) {
    %c0_i32 = arith.constant 0 : i32
    %c0_i32_0 = arith.constant 0 : i32
    %c0_i32_1 = arith.constant 0 : i32
    return %c0_i32, %c0_i32_0 : i32, i32
  }
  func.func @transform_9(%arg0: i32) -> (i32, i32) {
    %c0_i32 = arith.constant 0 : i32
    %c0_i32_0 = arith.constant 0 : i32
    %c0_i32_1 = arith.constant 0 : i32
    return %c0_i32, %c0_i32_0 : i32, i32
  }
  func.func @transform_10(%arg0: i32) -> (i32, i32) {
    %c0_i32 = arith.constant 0 : i32
    %c0_i32_0 = arith.constant 0 : i32
    %c0_i32_1 = arith.constant 0 : i32
    return %c0_i32, %c0_i32_0 : i32, i32
  }
  func.func @transform_11(%arg0: i32) -> (i32, i32) {
    %c0_i32 = arith.constant 0 : i32
    %c0_i32_0 = arith.constant 0 : i32
    %c0_i32_1 = arith.constant 0 : i32
    return %c0_i32, %c0_i32_0 : i32, i32
  }
  func.func @transform_12(%arg0: i32) -> (i32, i32, i32) {
    %c0_i32 = arith.constant 0 : i32
    %c0_i32_0 = arith.constant 0 : i32
    %c0_i32_1 = arith.constant 0 : i32
    return %arg0, %c0_i32, %c0_i32_0 : i32, i32, i32
  }
}

</mosaic_0001>

<bundles_post_ra>
// kernel: tpu_custom_call.1
= control target key start
LH: loop header
LB: loop body
LE: loop exit
PB: predicated region body
PF: predicated region fallthrough
CT: control target
= control target key end

     0   :  { %s1916_s0 = inlined_call_operand.vmem [shape: f32[2,4,256], index: 0, kind: input, shape index: {}]   ;;  %s1917_s1 = inlined_call_operand.vmem [shape: f32[9,1,256], index: 1, kind: input, shape index: {}]   ;;  %s1918_s2 = inlined_call_operand.vmem [shape: f32[32,4], index: 2, kind: input, shape index: {}]   ;;  %s1919_s3 = inlined_call_operand.vmem [shape: f32[32,1], index: 3, kind: input, shape index: {}]   ;;  %s1920_s4 = inlined_call_operand.vmem [shape: f32[8,4], index: 4, kind: input, shape index: {}]   ;;  %s1921_s5 = inlined_call_operand.vmem [shape: f32[8,1], index: 5, kind: input, shape index: {}]   ;;  %s1922_s6 = inlined_call_operand.vmem [shape: f32[8,72], index: 6, kind: input, shape index: {}]   ;;  %s1923_s7 = inlined_call_operand.vmem [shape: f32[8,1], index: 7, kind: input, shape index: {}]   ;;  %s1924_s8 = inlined_call_operand.vmem [shape: f32[8,72], index: 8, kind: input, shape index: {}]   ;;  %s1925_s9 = inlined_call_operand.vmem [shape: f32[8,1], index: 9, kind: input, shape index: {}]   ;;  %s1926_s10 = inlined_call_operand.vmem [shape: f32[32,72], index: 10, kind: input, shape index: {}]   ;;  %s1927_s11 = inlined_call_operand.vmem [shape: f32[32,1], index: 11, kind: input, shape index: {}]   ;;  %s1928_s12 = inlined_call_operand.hbm [shape: f32[2,32,256], index: 12, kind: output, shape index: {}]  }
   0x1   :  { %1941 = sst [smem:[#allocation5_spill]] %s1916_s0 }
   0x2   :  { %1942 = sst [smem:[#allocation6_spill]] %s1917_s1 }
   0x3   :  { %1943 = sst [smem:[#allocation7_spill]] %s1918_s2 }
   0x4   :  { %17 = vsyncpa [#allocation3], 0 }
   0x5   :  { %19 = vsyncpa [#allocation3 + $0x1], 0  ;;  %s1388_s21 = smov 0   ;;  %s1390_s22 = smov 0  }
   0x6   :  { %s1392_s23 = smov 0   ;;  %s1394_s24 = smov 0  }
   0x7 LB: > { %s1409_s25 = sadd.s32 4294967295, %s1311_s24   ;;  %s1149_s26 = sadd.s32 4294967294, %s1311_s24   ;;  %s1311_s24 = sphi %s1394_s24, %s1958_s24   ;;  %s1307_s23 = sphi %s1392_s23, %s1957_s23   ;;  %s1303_s22 = sphi %s1390_s22, %s1956_s22   ;;  %s1299_s21 = sphi %s1388_s21, %s1955_s21  }
   0x8   : > { %s1413_s27 = sadd.s32 1, %s1311_s24   ;;  %s289_s28 = sadd.s32 1, %s1307_s23 }
   0x9   : > { %s286_s29 = ssub.s32 %s1311_s24, %s1413_s27  ;;  %p299_p0 = scmp.ne.s32.totalorder %s1307_s23, %s1303_s22 }
   0xa   : > { %p287_p1 = scmp.eq.s32.totalorder %s286_s29, 0  ;;  %p300_p2 = scmp.eq.s32.totalorder %s1409_s25, 1 }
   0xb   : > { %p305_p3 = scmp.ne.s32.totalorder %s1303_s22, %s1299_s21  ;;  %p306_p4 = scmp.eq.s32.totalorder %s1149_s26, 1 }
   0xc   : > { %s1424_s30 = scalar_select %p287_p1, %s1307_s23, %s289_s28  }
   0xd   : > { %p1426_p5 = por %p300_p2, %p299_p0  ;;  %p1430_p6 = por %p306_p4, %p305_p3 }
   0xe   : > { %p1152_p7 = scmp.ge.s32.totalorder %s1311_s24, 1  ;;  %p365_p8 = scmp.lt.s32.totalorder %s1311_s24, 3 }
  0x10   : > { %p366_p9 = pnand %p1152_p7, %p365_p8 }
  0x11   : > { %p407_p10 = scmp.lt.s32.totalorder (!%p366_p9), %s1409_s25, 1  ;;  %s1946_s0 = sld [smem:[#allocation5_spill]] (!%p366_p9) }
  0x12   : > { %369 = sbr.rel (%p366_p9) target bundleno = 1078 (0x436), region = 68  ;;  %s1314_s15 = smov (!%p366_p9), 112  }
  0x13   : > { %s1315_s16 = smov (!%p366_p9), 111   ;;  %s1933_s19 = smov (!%p366_p9), 1  }
  0x14   : > { %s1931_s20 = smov (!%p366_p9), 15   ;;  %s1935_s28 = smov (!%p366_p9), 17  }
  0x15   : > { %s1947_s2 = sld [smem:[#allocation7_spill]] (!%p366_p9)  ;;  %s1950_s29 = smov (!%p366_p9), 1  }
  0x16   : > { %s1948_s1 = sld [smem:[#allocation6_spill]] (!%p366_p9) }
  0x17   : > { %v523_v0 = vld [vmem:[%s1921_s5] sm:$0xff]  ;;  %v1313_v1 = vmov 0   ;;  %s408_s17 = scalar_select %p407_p10, %s1409_s25, 1  ;;  %vm458_vm0 = vcmask 1043456   ;;  %vm445_vm1 = vcmask 31744   ;;  %v588_v18 = vlaneseq }
  0x18   : > { %1246 = vset.pattern.permute.xlu0 %v1313_v1  ;;  %1247 = vset.pattern.permute.xlu2 %v1313_v1  ;;  %v522_v6 = vld [vmem:[%s1920_s4] sm:$0xff]  ;;  %vm727_vm10 = vcmask 588800  }
  0x19   : > { %526 = vperm.xlu0 %1246, %v523_v0   ;;  %1248 = vset.pattern.permute.xlu1 %v1313_v1  ;;  %s1195_s18 = sshll.u32 %s408_s17, 3  ;;  %s1939_s17 = smov 113   ;;  %v1495_v20 = vand.u32 127, %v588_v18  ;;  %v583_v52 = vld [vmem:[%s1923_s7] sm:$0xff] }
  0x1a   : > { %s411_s26 = scalar_lea.vmem %s1946_s0, %s1195_s18  ;;  %s1929_s18 = smov 127  }
  0x1b   : > { %v412_v2 = vld [vmem:[%s411_s26] sm:$0xff]  ;;  %s1937_s26 = smov 16   ;;  %v414_v17 = vld [vmem:[%s1947_s2 + $0x8] sm:$0xff]  ;;  %v415_v22 = vld [vmem:[%s1947_s2 + $0x10] sm:$0xff]  ;;  %vm710_vm2 = vcmp.lt.s32.totalorder %v1495_v20, 111  ;;  %vm694_vm3 = vcmp.lt.s32.totalorder %v1495_v20, 112 }
  0x1c   : > { %442 = vst [vmem:[#allocation1] ss:$2 sm:$0xff] %v412_v2  ;;  %v521_v3 = vmax.f32 %v412_v2, 0.0  ;;  %v413_v16 = vld [vmem:[%s1947_s2] sm:$0xff]  ;;  %v1177_v21 = vld [vmem:[%s1948_s1 + $0x10] sm:$0x3] }
  0x1d   : > { %v1506_v23 = vperm.slane %v1177_v21, 0  ;;  %v1508_v24 = vperm.slane %v1177_v21, 1  ;;  %v1176_v32 = vld [vmem:[%s1948_s1 + $0xe] sm:$0x3]  ;;  %v416_v33 = vld [vmem:[%s1947_s2 + $0x18] sm:$0xff]  ;;  %vm678_vm4 = vcmp.lt.s32.totalorder %v1495_v20, 113 }
  0x1e   : > { %v1175_v34 = vld [vmem:[%s1948_s1 + $0xc] sm:$0x3]  ;;  %v1526_v35 = vperm.slane %v1176_v32, 0  ;;  %v1528_v36 = vperm.slane %v1176_v32, 1  ;;  %v1174_v47 = vld [vmem:[%s1948_s1 + $0xa] sm:$0x3] }
  0x1f   : > { %v1533_v38 = vperm.slane %v1175_v34, 0  ;;  %v1535_v39 = vperm.slane %v1175_v34, 1  ;;  %v1173_v51 = vld [vmem:[%s1948_s1 + $0x8] sm:$0x3]  ;;  %vm662_vm5 = vcmp.lt.s32.totalorder %v1495_v20, 127  ;;  %v1559_v53 = vperm.slane %v1174_v47, 0 }
  0x20   : > { %v1561_v54 = vperm.slane %v1174_v47, 1  ;;  %v1563_v56 = vperm.slane %v1173_v51, 0  ;;  %v1565_v57 = vperm.slane %v1173_v51, 1  ;;  %v1172_v63 = vld [vmem:[%s1948_s1 + $0x6] sm:$0x3]  ;;  %vm637_vm6 = vcmp.lt.s32.totalorder %v1495_v20, 1 }
  0x21   : > { %v1171_v2 = vld [vmem:[%s1948_s1 + $0x4] sm:$0x3]  ;;  %vm621_vm7 = vcmp.lt.s32.totalorder %v1495_v20, 15  ;;  %vm605_vm8 = vcmp.lt.s32.totalorder %v1495_v20, 16  ;;  %vm590_vm9 = vcmp.lt.s32.totalorder %v1495_v20, 17  ;;  %v892_v20 = vld [vmem:[%s1926_s10 + $0x8] sm:$0xff] }
  0x23   : > { %v443_v4 = vld.sshfl [vmem:[#allocation1] sm:$0xff pattern:$0x75316420]  ;;  %v444_v5 = vld.sshfl [vmem:[#allocation1 + $0x8] sm:$0xff pattern:$0x75316420] }
  0x24   : > { %530 = vst [vmem:[#allocation1] ss:$2 sm:$0xff] %v521_v3  ;;  %1156 = vmatpush.msk.msra.mxu0 %vm458_vm0, %v443_v4  ;;  %1161 = vmatpush.msk.msra.mxu1 %vm458_vm0, %v444_v5  ;;  %v1584_v4 = vperm.slane %v1172_v63, 0  ;;  %v1586_v5 = vperm.slane %v1172_v63, 1 }
  0x25   : > { %1157 = vmatmul.msk.f32.vlgmr.msra.gmra.mxu0 %vm445_vm1, %v413_v16  ;;  %1162 = vmatmul.msk.f32.vlgmr.msra.gmra.mxu1 %vm445_vm1, %v413_v16  ;;  %v1170_v16 = vld [vmem:[%s1948_s1 + $0x2] sm:$0x3] }
  0x26   : > { %v1611_v21 = vperm.slane %v1170_v16, 1 }
  0x2b   : > { %v531_v7 = vld.sshfl [vmem:[#allocation1] sm:$0xff pattern:$0x75316420]  ;;  %v532_v8 = vld.sshfl [vmem:[#allocation1 + $0x8] sm:$0xff pattern:$0x75316420] }
  0x2c   : > { %1166 = vmatpush.msk.msra.mxu2 %vm458_vm0, %v531_v7  ;;  %1168 = vmatpush.msk.msra.mxu3 %vm458_vm0, %v532_v8  ;;  %v1589_v7 = vperm.slane %v1171_v2, 0  ;;  %v1591_v8 = vperm.slane %v1171_v2, 1 }
  0x2d   : > { %1167 = vmatmul.msk.f32.vlgmr.msra.gmra.mxu2 %vm445_vm1, %v522_v6  ;;  %1169 = vmatmul.msk.f32.vlgmr.msra.gmra.mxu3 %vm445_vm1, %v522_v6 }
  0x2e   : > { %1158 = vmatmul.msk.f32.gmra.mxu0 %vm445_vm1, %v414_v17  ;;  %1163 = vmatmul.msk.f32.gmra.mxu1 %vm445_vm1, %v414_v17 }
  0x36   : > { %1159 = vmatmul.msk.f32.gmra.mxu0 %vm445_vm1, %v415_v22  ;;  %1164 = vmatmul.msk.f32.gmra.mxu1 %vm445_vm1, %v415_v22 }
  0x3e   : > { %1160 = vmatmul.msk.f32.gmra.mxu0 %vm445_vm1, %v416_v33  ;;  %1165 = vmatmul.msk.f32.gmra.mxu1 %vm445_vm1, %v416_v33 }
  0x8b   : > { %v527_v9 = vpop.permute.xlu0 %526 }
  0xb0   : > { %v557_v10 = vpop.f32.mrf.mxu2  ;;  %v577_v11 = vpop.f32.mrf.mxu3 }
  0xb1   : > { %v558_v12 = vadd.f32 %v557_v10, %v527_v9  ;;  %v578_v13 = vadd.f32 %v577_v11, %v527_v9 }
  0xb3   : > { %v1449_v14 = vmax.f32 %v558_v12, 0.0  ;;  %v1451_v15 = vmax.f32 %v578_v13, 0.0 }
  0xb5   : > { %692 = vrot.lane.b32.xlu2 %v1451_v15, %s1314_s15  ;;  %708 = vrot.lane.b32.xlu1 %v1451_v15, %s1315_s16  ;;  %v656_v0 = vmul.f32 %v1563_v56, %v1449_v14  ;;  %v657_v1 = vmul.f32 %v1565_v57, %v1451_v15 }
  0xb6   : > { %706 = vrot.lane.b32.xlu0 %v1449_v14, %s1315_s16 }
  0xbd   : > { %674 = vrot.lane.b32.xlu2 %v1449_v14, %s1939_s17  ;;  %690 = vrot.lane.b32.xlu1 %v1449_v14, %s1314_s15 }
  0xbe   : > { %676 = vrot.lane.b32.xlu0 %v1451_v15, %s1939_s17 }
  0xc5   : > { %660 = vrot.lane.b32.xlu2 %v1451_v15, %s1929_s18  ;;  %658 = vrot.lane.b32.xlu1 %v1449_v14, %s1929_s18  ;;  %s1949_s18 = smov 127  }
  0xc6   : > { %633 = vrot.lane.b32.xlu0 %v1449_v14, %s1933_s19 }
  0xcd   : > { %617 = vrot.lane.b32.xlu2 %v1449_v14, %s1931_s20  ;;  %635 = vrot.lane.b32.xlu1 %v1451_v15, %s1933_s19  ;;  %s1951_s19 = smov 15  }
  0xce   : > { %619 = vrot.lane.b32.xlu0 %v1451_v15, %s1931_s20  ;;  %s1952_s20 = smov 16  }
  0xd5   : > { %603 = vrot.lane.b32.xlu2 %v1451_v15, %s1937_s26  ;;  %601 = vrot.lane.b32.xlu1 %v1449_v14, %s1937_s26  ;;  %s1953_s26 = smov 17  }
  0xd6   : > { %584 = vrot.lane.b32.xlu0 %v1449_v14, %s1935_s28 }
  0xdd   : > { %586 = vrot.lane.b32.xlu1 %v1451_v15, %s1935_s28  ;;  %724 = vperm.xlu2 %1247, %v583_v52  }
 0x10f   : > { %v693_v19 = vpop.permute.xlu2 %692 }
 0x117   : > { %v675_v27 = vpop.permute.xlu2 %674 }
 0x11f   : > { %v661_v48 = vpop.permute.xlu2 %660 }
 0x127   : > { %v709_v25 = vpop.permute.xlu1 %708  ;;  %v618_v3 = vpop.permute.xlu2 %617 }
 0x128   : > { %v707_v26 = vpop.permute.xlu0 %706 }
 0x129   : > { %v711_v28 = vsel %vm710_vm2, %v707_v26, %v709_v25  ;;  %v712_v29 = vsel %vm710_vm2, %v709_v25, %v707_v26 }
 0x12a   : > { %v720_v30 = vmul.f32 %v1506_v23, %v711_v28  ;;  %v721_v31 = vmul.f32 %v1508_v24, %v712_v29 }
 0x12c   : > { %738 = vmatpush.msrb.mxu0 %v720_v30  ;;  %758 = vmatpush.msrb.mxu1 %v721_v31  ;;  %v593_v30 = vld [vmem:[%s1948_s1] sm:$0x3]  ;;  %s1196_s1 = sshll.u32 %s1409_s25, 6 }
 0x12d   : > { %v1623_v31 = vperm.slane %v593_v30, 0  ;;  %v1625_v32 = vperm.slane %v593_v30, 1 }
 0x12f   : > { %v691_v37 = vpop.permute.xlu1 %690  ;;  %v604_v22 = vpop.permute.xlu2 %603 }
 0x130   : > { %v695_v40 = vsel %vm694_vm3, %v691_v37, %v693_v19  ;;  %v696_v41 = vsel %vm694_vm3, %v693_v19, %v691_v37  ;;  %v677_v42 = vpop.permute.xlu0 %676  ;;  %v1609_v19 = vperm.slane %v1170_v16, 0 }
 0x131   : > { %v679_v43 = vsel %vm678_vm4, %v675_v27, %v677_v42  ;;  %v680_v44 = vsel %vm678_vm4, %v677_v42, %v675_v27  ;;  %v704_v45 = vmul.f32 %v1526_v35, %v695_v40  ;;  %v705_v46 = vmul.f32 %v1528_v36, %v696_v41 }
 0x132   : > { %v688_v49 = vmul.f32 %v1533_v38, %v679_v43  ;;  %v689_v50 = vmul.f32 %v1535_v39, %v680_v44  ;;  %v582_v43 = vld [vmem:[%s1922_s6] sm:$0xff]  ;;  %v1638_v44 = vpop.f32.mrf.mxu0 }
 0x133   : > { %739 = vmatpush.msrb.mxu0 %v704_v45  ;;  %759 = vmatpush.msrb.mxu1 %v705_v46  ;;  %v1640_v45 = vpop.f32.mrf.mxu1 }
 0x135   : > { %740 = vmatpush.msrb.mxu0 %v688_v49  ;;  %760 = vmatpush.msrb.mxu1 %v689_v50 }
 0x137   : > { %v659_v55 = vpop.permute.xlu1 %658  ;;  %v725_v52 = vpop.permute.xlu2 %724 }
 0x138   : > { %v663_v58 = vsel %vm662_vm5, %v659_v55, %v661_v48  ;;  %v664_v59 = vsel %vm662_vm5, %v661_v48, %v659_v55  ;;  %v634_v60 = vpop.permute.xlu0 %633 }
 0x139   : > { %v672_v61 = vmul.f32 %v1559_v53, %v663_v58  ;;  %v673_v62 = vmul.f32 %v1561_v54, %v664_v59 }
 0x13a   : > { %v1642_v46 = vpop.f32.mrf.mxu0 }
 0x13b   : > { %741 = vmatpush.msrb.mxu0 %v672_v61  ;;  %761 = vmatpush.msrb.mxu1 %v673_v62  ;;  %v1644_v47 = vpop.f32.mrf.mxu1 }
 0x13d   : > { %742 = vmatpush.msrb.mxu0 %v656_v0  ;;  %762 = vmatpush.msrb.mxu1 %v657_v1 }
 0x13f   : > { %v636_v6 = vpop.permute.xlu1 %635 }
 0x140   : > { %v638_v9 = vsel %vm637_vm6, %v634_v60, %v636_v6  ;;  %v639_v10 = vsel %vm637_vm6, %v636_v6, %v634_v60  ;;  %v620_v11 = vpop.permute.xlu0 %619 }
 0x141   : > { %v622_v12 = vsel %vm621_vm7, %v618_v3, %v620_v11  ;;  %v623_v13 = vsel %vm621_vm7, %v620_v11, %v618_v3  ;;  %v647_v14 = vmul.f32 %v1584_v4, %v639_v10  ;;  %v648_v15 = vmul.f32 %v1586_v5, %v638_v9 }
 0x142   : > { %v631_v17 = vmul.f32 %v1589_v7, %v623_v13  ;;  %v632_v18 = vmul.f32 %v1591_v8, %v622_v12  ;;  %v1646_v48 = vpop.f32.mrf.mxu0 }
 0x143   : > { %743 = vmatpush.msrb.mxu0 %v647_v14  ;;  %763 = vmatpush.msrb.mxu1 %v648_v15  ;;  %v1648_v49 = vpop.f32.mrf.mxu1 }
 0x145   : > { %744 = vmatpush.msrb.mxu0 %v631_v17  ;;  %764 = vmatpush.msrb.mxu1 %v632_v18 }
 0x147   : > { %v602_v25 = vpop.permute.xlu1 %601 }
 0x148   : > { %v606_v26 = vsel %vm605_vm8, %v602_v25, %v604_v22  ;;  %v607_v27 = vsel %vm605_vm8, %v604_v22, %v602_v25  ;;  %v585_v33 = vpop.permute.xlu0 %584 }
 0x149   : > { %v615_v28 = vmul.f32 %v1609_v19, %v607_v27  ;;  %v616_v29 = vmul.f32 %v1611_v21, %v606_v26  ;;  %v774_v26 = vld [vmem:[%s1925_s9] sm:$0xff] }
 0x14a   : > { %v1650_v50 = vpop.f32.mrf.mxu0 }
 0x14b   : > { %745 = vmatpush.msrb.mxu0 %v615_v28  ;;  %765 = vmatpush.msrb.mxu1 %v616_v29  ;;  %v1652_v51 = vpop.f32.mrf.mxu1 }
 0x14f   : > { %v587_v34 = vpop.permute.xlu1 %586 }
 0x150   : > { %v591_v37 = vsel %vm590_vm9, %v585_v33, %v587_v34  ;;  %v592_v40 = vsel %vm590_vm9, %v587_v34, %v585_v33 }
 0x151   : > { %v599_v41 = vmul.f32 %v1623_v31, %v592_v40  ;;  %v600_v42 = vmul.f32 %v1625_v32, %v591_v37 }
 0x153   : > { %746 = vmatpush.msrb.mxu0 %v599_v41  ;;  %766 = vmatpush.msrb.mxu1 %v600_v42 }
 0x154   : > { %1178 = vmatmul.msk.f32.vlgmr.msrb.gmra.mxu0 %vm727_vm10, %v582_v43  ;;  %1179 = vmatmul.msk.f32.vlgmr.msrb.gmra.mxu1 %vm727_vm10, %v582_v43 }
 0x1d1   : > { %v748_v55 = vpop.f32.mrf.mxu0  ;;  %v768_v58 = vpop.f32.mrf.mxu1 }
 0x1d2   : > { %v749_v59 = vadd.f32 %v748_v55, %v725_v52  ;;  %v769_v60 = vadd.f32 %v768_v58, %v725_v52 }
 0x1d4   : > { %v771_v61 = vmax.f32 %v749_v59, 0.0  ;;  %v772_v62 = vmax.f32 %v769_v60, 0.0 }
 0x1d6   : > { %835 = vrot.lane.b32.xlu1 %v772_v62, %s1315_s16  ;;  %825 = vrot.lane.b32.xlu2 %v771_v61, %s1314_s15  ;;  %v807_v40 = vmul.f32 %v771_v61, %v1563_v56  ;;  %v808_v41 = vmul.f32 %v772_v62, %v1565_v57 }
 0x1d7   : > { %833 = vrot.lane.b32.xlu0 %v771_v61, %s1315_s16 }
 0x1de   : > { %817 = vrot.lane.b32.xlu1 %v771_v61, %s1939_s17  ;;  %819 = vrot.lane.b32.xlu2 %v772_v62, %s1939_s17  ;;  %s1954_s17 = smov 113  }
 0x1df   : > { %827 = vrot.lane.b32.xlu0 %v772_v62, %s1314_s15 }
 0x1e6   : > { %811 = vrot.lane.b32.xlu1 %v772_v62, %s1949_s18  ;;  %799 = vrot.lane.b32.xlu2 %v771_v61, %s1950_s29 }
 0x1e7   : > { %809 = vrot.lane.b32.xlu0 %v771_v61, %s1949_s18 }
 0x1ee   : > { %791 = vrot.lane.b32.xlu1 %v771_v61, %s1951_s19  ;;  %793 = vrot.lane.b32.xlu2 %v772_v62, %s1951_s19 }
 0x1ef   : > { %801 = vrot.lane.b32.xlu0 %v772_v62, %s1950_s29 }
 0x1f6   : > { %785 = vrot.lane.b32.xlu1 %v772_v62, %s1952_s20  ;;  %775 = vrot.lane.b32.xlu2 %v771_v61, %s1953_s26 }
 0x1f7   : > { %783 = vrot.lane.b32.xlu0 %v771_v61, %s1952_s20 }
 0x1fe   : > { %843 = vperm.xlu1 %1248, %v774_v26  }
 0x1ff   : > { %777 = vrot.lane.b32.xlu0 %v772_v62, %s1953_s26 }
 0x230   : > { %v826_v63 = vpop.permute.xlu2 %825 }
 0x238   : > { %v820_v10 = vpop.permute.xlu2 %819 }
 0x240   : > { %v800_v27 = vpop.permute.xlu2 %799 }
 0x248   : > { %v836_v0 = vpop.permute.xlu1 %835  ;;  %v794_v43 = vpop.permute.xlu2 %793 }
 0x249   : > { %v834_v1 = vpop.permute.xlu0 %833 }
 0x24a   : > { %v837_v2 = vsel %vm710_vm2, %v834_v1, %v836_v0  ;;  %v838_v3 = vsel %vm710_vm2, %v836_v0, %v834_v1 }
 0x24b   : > { %v839_v6 = vmul.f32 %v837_v2, %v1506_v23  ;;  %v840_v9 = vmul.f32 %v838_v3, %v1508_v24 }
 0x24d   : > { %856 = vmatpush.msra.mxu0 %v839_v6  ;;  %876 = vmatpush.msra.mxu1 %v840_v9 }
 0x250   : > { %v818_v11 = vpop.permute.xlu1 %817 }
 0x251   : > { %v828_v12 = vpop.permute.xlu0 %827  ;;  %v821_v13 = vsel %vm678_vm4, %v818_v11, %v820_v10  ;;  %v822_v14 = vsel %vm678_vm4, %v820_v10, %v818_v11  ;;  %v776_v11 = vpop.permute.xlu2 %775 }
 0x252   : > { %v829_v15 = vsel %vm694_vm3, %v826_v63, %v828_v12  ;;  %v830_v16 = vsel %vm694_vm3, %v828_v12, %v826_v63  ;;  %v823_v22 = vmul.f32 %v821_v13, %v1533_v38  ;;  %v824_v25 = vmul.f32 %v822_v14, %v1535_v39 }
 0x253   : > { %v831_v17 = vmul.f32 %v829_v15, %v1526_v35  ;;  %v832_v18 = vmul.f32 %v830_v16, %v1528_v36 }
 0x255   : > { %857 = vmatpush.msra.mxu0 %v831_v17  ;;  %877 = vmatpush.msra.mxu1 %v832_v18  ;;  %v773_v17 = vld [vmem:[%s1924_s8] sm:$0xff] }
 0x257   : > { %858 = vmatpush.msra.mxu0 %v823_v22  ;;  %878 = vmatpush.msra.mxu1 %v824_v25 }
 0x258   : > { %v812_v28 = vpop.permute.xlu1 %811 }
 0x259   : > { %v810_v29 = vpop.permute.xlu0 %809 }
 0x25a   : > { %v813_v30 = vsel %vm662_vm5, %v810_v29, %v812_v28  ;;  %v814_v33 = vsel %vm662_vm5, %v812_v28, %v810_v29 }
 0x25b   : > { %v815_v34 = vmul.f32 %v813_v30, %v1559_v53  ;;  %v816_v37 = vmul.f32 %v814_v33, %v1561_v54  ;;  %v417_v30 = vld [vmem:[%s1919_s3] sm:$0xff]  ;;  %v418_v33 = vld [vmem:[%s1919_s3 + $0x8] sm:$0xff] }
 0x25d   : > { %859 = vmatpush.msra.mxu0 %v815_v34  ;;  %879 = vmatpush.msra.mxu1 %v816_v37  ;;  %v420_v34 = vld [vmem:[%s1919_s3 + $0x18] sm:$0xff]  ;;  %v895_v37 = vld [vmem:[%s1927_s11] sm:$0xff] }
 0x25f   : > { %860 = vmatpush.msra.mxu0 %v807_v40  ;;  %880 = vmatpush.msra.mxu1 %v808_v41  ;;  %v419_v40 = vld [vmem:[%s1919_s3 + $0x10] sm:$0xff] }
 0x260   : > { %v792_v42 = vpop.permute.xlu1 %791  ;;  %v897_v41 = vld [vmem:[%s1927_s11 + $0x10] sm:$0xff] }
 0x261   : > { %v802_v52 = vpop.permute.xlu0 %801  ;;  %v795_v55 = vsel %vm621_vm7, %v792_v42, %v794_v43  ;;  %v796_v58 = vsel %vm621_vm7, %v794_v43, %v792_v42  ;;  %v898_v42 = vld [vmem:[%s1927_s11 + $0x18] sm:$0xff]  ;;  %v896_v43 = vld [vmem:[%s1927_s11 + $0x8] sm:$0xff] }
 0x262   : > { %v803_v59 = vsel %vm637_vm6, %v800_v27, %v802_v52  ;;  %v804_v60 = vsel %vm637_vm6, %v802_v52, %v800_v27  ;;  %v797_v63 = vmul.f32 %v796_v58, %v1589_v7  ;;  %v798_v0 = vmul.f32 %v795_v55, %v1591_v8 }
 0x263   : > { %v805_v61 = vmul.f32 %v804_v60, %v1584_v4  ;;  %v806_v62 = vmul.f32 %v803_v59, %v1586_v5 }
 0x265   : > { %861 = vmatpush.msra.mxu0 %v805_v61  ;;  %881 = vmatpush.msra.mxu1 %v806_v62 }
 0x267   : > { %862 = vmatpush.msra.mxu0 %v797_v63  ;;  %882 = vmatpush.msra.mxu1 %v798_v0 }
 0x268   : > { %v786_v1 = vpop.permute.xlu1 %785 }
 0x269   : > { %v784_v2 = vpop.permute.xlu0 %783 }
 0x26a   : > { %v787_v3 = vsel %vm605_vm8, %v784_v2, %v786_v1  ;;  %v788_v6 = vsel %vm605_vm8, %v786_v1, %v784_v2 }
 0x26b   : > { %v789_v9 = vmul.f32 %v788_v6, %v1609_v19  ;;  %v790_v10 = vmul.f32 %v787_v3, %v1611_v21 }
 0x26d   : > { %863 = vmatpush.msra.mxu0 %v789_v9  ;;  %883 = vmatpush.msra.mxu1 %v790_v10 }
 0x270   : > { %v844_v18 = vpop.permute.xlu1 %843 }
 0x271   : > { %v778_v12 = vpop.permute.xlu0 %777 }
 0x272   : > { %v779_v13 = vsel %vm590_vm9, %v776_v11, %v778_v12  ;;  %v780_v14 = vsel %vm590_vm9, %v778_v12, %v776_v11 }
 0x273   : > { %v781_v15 = vmul.f32 %v780_v14, %v1623_v31  ;;  %v782_v16 = vmul.f32 %v779_v13, %v1625_v32 }
 0x275   : > { %864 = vmatpush.msra.mxu0 %v781_v15  ;;  %884 = vmatpush.msra.mxu1 %v782_v16 }
 0x276   : > { %1180 = vmatmul.msk.f32.vlgmr.msra.gmra.mxu0 %vm727_vm10, %v773_v17  ;;  %1181 = vmatmul.msk.f32.vlgmr.msra.gmra.mxu1 %vm727_vm10, %v773_v17 }
 0x2f3   : > { %v866_v22 = vpop.f32.mrf.mxu0  ;;  %v886_v25 = vpop.f32.mrf.mxu1 }
 0x2f4   : > { %v867_v26 = vadd.f32 %v866_v22, %v844_v18  ;;  %v887_v27 = vadd.f32 %v886_v25, %v844_v18 }
 0x2f6   : > { %v1728_v28 = vmax.f32 %v867_v26, 0.0  ;;  %v1730_v29 = vmax.f32 %v887_v27, 0.0 }
 0x2f8   : > { %959 = vrot.lane.b32.xlu0 %v1730_v29, %s1315_s16  ;;  %949 = vrot.lane.b32.xlu1 %v1728_v28, %s1314_s15  ;;  %v931_v18 = vmul.f32 %v1728_v28, %v1563_v56  ;;  %v932_v22 = vmul.f32 %v1730_v29, %v1565_v57 }
 0x2f9   : > { %957 = vrot.lane.b32.xlu2 %v1728_v28, %s1315_s16  ;;  %s1083_s16 = scalar_lea.hbm %s1928_s12, %s1196_s1 }
 0x2fa   : > { %s1086_s25 = sshll.u32 %s1083_s16, 4  ;;  %s1087_s25 = int_to_ptr.hbm [resolvable:$true] %s1086_s25 }
 0x2fb   : > { %s1263_s28 = sshra.s32 %s1087_s25, 4  ;;  %s1264_s28 = int_to_ptr.hbm [resolvable:$true] %s1263_s28 }
 0x2fc   : > { %p1270_p0 = scmp.lt.s32.totalorder %s1264_s28, %s1928_s12 }
 0x300   : > { %941 = vrot.lane.b32.xlu0 %v1728_v28, %s1954_s17  ;;  %943 = vrot.lane.b32.xlu1 %v1730_v29, %s1954_s17 }
 0x301   : > { %951 = vrot.lane.b32.xlu2 %v1730_v29, %s1314_s15  ;;  %s1269_s15 = scalar_lea.hbm %s1928_s12, 128 }
 0x308   : > { %935 = vrot.lane.b32.xlu0 %v1730_v29, %s1949_s18  ;;  %923 = vrot.lane.b32.xlu1 %v1728_v28, %s1950_s29 }
 0x309   : > { %933 = vrot.lane.b32.xlu2 %v1728_v28, %s1949_s18 }
 0x310   : > { %915 = vrot.lane.b32.xlu0 %v1728_v28, %s1951_s19  ;;  %917 = vrot.lane.b32.xlu1 %v1730_v29, %s1951_s19 }
 0x311   : > { %925 = vrot.lane.b32.xlu2 %v1730_v29, %s1950_s29  ;;  %s404_s29 = sand.u32 1, %s1303_s22  }
 0x312   : > { %s1153_s19 = sshll.u32 %s404_s29, 6 }
 0x313   : > { %s1865_s0 = scalar_lea.vmem [#allocation2], %s1153_s19  ;;  %s1265_s19 = scalar_lea.hbm %s1264_s28, 64 }
 0x314   : > { %s1084_s18 = sshll.u32 %s1865_s0, 4  ;;  %p1266_p11 = scmp.ne.s32.totalorder %s1264_s28, %s1265_s19  ;;  %s1085_s18 = int_to_ptr.vmem [resolvable:$true] %s1084_s18 }
 0x315   : > { %p1271_p1 = scmp.lt.s32.totalorder %s1269_s15, %s1265_s19 }
 0x316   : > { %p1267_p12 = pnand %p1266_p11, %p1426_p5 }
 0x317   : > { %p1272_p2 = por %p1271_p1, %p1270_p0 }
 0x318   : > { %909 = vrot.lane.b32.xlu0 %v1730_v29, %s1952_s20  ;;  %899 = vrot.lane.b32.xlu1 %v1728_v28, %s1953_s26  ;;  %p1268_p13 = pneg %p1267_p12 }
 0x319   : > { %907 = vrot.lane.b32.xlu2 %v1728_v28, %s1952_s20 }
 0x31a   : > { %p1273_p3 = pnand %p1272_p2, %p1268_p13 }
 0x320   : > { %423 = vperm.xlu0 %1246, %v417_v30   ;;  %428 = vperm.xlu1 %1248, %v418_v33  }
 0x321   : > { %901 = vrot.lane.b32.xlu2 %v1730_v29, %s1953_s26  ;;  %s1072_s26 = scalar_lea.sflag [#allocation3], %s404_s29 }
 0x328   : > { %438 = vperm.xlu0 %1246, %v420_v34   ;;  %967 = vperm.xlu1 %1248, %v895_v37  }
 0x329   : > { %433 = vperm.xlu2 %1247, %v419_v40  }
 0x330   : > { %977 = vperm.xlu0 %1246, %v897_v41   ;;  %982 = vperm.xlu1 %1248, %v898_v42  }
 0x331   : > { %972 = vperm.xlu2 %1247, %v896_v43   ;;  %v891_v43 = vld [vmem:[%s1926_s10] sm:$0xff] }
 0x353   : > { %v958_v52 = vpop.permute.xlu2 %957 }
 0x35b   : > { %v952_v55 = vpop.permute.xlu2 %951 }
 0x363   : > { %v934_v60 = vpop.permute.xlu2 %933 }
 0x36a   : > { %v960_v58 = vpop.permute.xlu0 %959  ;;  %v950_v59 = vpop.permute.xlu1 %949 }
 0x36b   : > { %v961_v61 = vsel %vm710_vm2, %v958_v52, %v960_v58  ;;  %v962_v62 = vsel %vm710_vm2, %v960_v58, %v958_v52  ;;  %v953_v63 = vsel %vm694_vm3, %v950_v59, %v952_v55  ;;  %v954_v0 = vsel %vm694_vm3, %v952_v55, %v950_v59  ;;  %v926_v13 = vpop.permute.xlu2 %925 }
 0x36c   : > { %v963_v1 = vmul.f32 %v961_v61, %v1506_v23  ;;  %v964_v2 = vmul.f32 %v962_v62, %v1508_v24  ;;  %v955_v3 = vmul.f32 %v953_v63, %v1526_v35  ;;  %v956_v6 = vmul.f32 %v954_v0, %v1528_v36 }
 0x36e   : > { %1004 = vmatpush.msrb.mxu2 %v963_v1  ;;  %1033 = vmatpush.msrb.mxu3 %v964_v2 }
 0x370   : > { %1005 = vmatpush.msrb.mxu2 %v955_v3  ;;  %1034 = vmatpush.msrb.mxu3 %v956_v6 }
 0x372   : > { %v942_v9 = vpop.permute.xlu0 %941  ;;  %v944_v10 = vpop.permute.xlu1 %943 }
 0x373   : > { %v945_v11 = vsel %vm678_vm4, %v942_v9, %v944_v10  ;;  %v946_v12 = vsel %vm678_vm4, %v944_v10, %v942_v9  ;;  %v908_v25 = vpop.permute.xlu2 %907 }
 0x374   : > { %v947_v23 = vmul.f32 %v945_v11, %v1533_v38  ;;  %v948_v24 = vmul.f32 %v946_v12, %v1535_v39 }
 0x376   : > { %1006 = vmatpush.msrb.mxu2 %v947_v23  ;;  %1035 = vmatpush.msrb.mxu3 %v948_v24 }
 0x37a   : > { %v936_v35 = vpop.permute.xlu0 %935  ;;  %v924_v14 = vpop.permute.xlu1 %923 }
 0x37b   : > { %v937_v36 = vsel %vm662_vm5, %v934_v60, %v936_v35  ;;  %v938_v15 = vsel %vm662_vm5, %v936_v35, %v934_v60  ;;  %v927_v38 = vsel %vm637_vm6, %v924_v14, %v926_v13  ;;  %v928_v39 = vsel %vm637_vm6, %v926_v13, %v924_v14  ;;  %v902_v29 = vpop.permute.xlu2 %901 }
 0x37c   : > { %v939_v16 = vmul.f32 %v937_v36, %v1559_v53  ;;  %v940_v17 = vmul.f32 %v938_v15, %v1561_v54  ;;  %v930_v53 = vmul.f32 %v927_v38, %v1586_v5  ;;  %v929_v54 = vmul.f32 %v928_v39, %v1584_v4 }
 0x37e   : > { %1007 = vmatpush.msrb.mxu2 %v939_v16  ;;  %1036 = vmatpush.msrb.mxu3 %v940_v17 }
 0x380   : > { %1008 = vmatpush.msrb.mxu2 %v931_v18  ;;  %1037 = vmatpush.msrb.mxu3 %v932_v22 }
 0x382   : > { %v916_v26 = vpop.permute.xlu0 %915  ;;  %v918_v27 = vpop.permute.xlu1 %917  ;;  %1038 = vmatpush.msrb.mxu3 %v930_v53  ;;  %1009 = vmatpush.msrb.mxu2 %v929_v54 }
 0x383   : > { %v919_v30 = vsel %vm621_vm7, %v916_v26, %v918_v27  ;;  %v920_v56 = vsel %vm621_vm7, %v918_v27, %v916_v26  ;;  %v434_v52 = vpop.permute.xlu2 %433 }
 0x384   : > { %v921_v28 = vmul.f32 %v920_v56, %v1589_v7  ;;  %v922_v57 = vmul.f32 %v919_v30, %v1591_v8  ;;  %v487_v14 = vadd.f32 %v1646_v48, %v434_v52  ;;  %v516_v36 = vadd.f32 %v1648_v49, %v434_v52 }
 0x386   : > { %1010 = vmatpush.msrb.mxu2 %v921_v28  ;;  %1039 = vmatpush.msrb.mxu3 %v922_v57 }
 0x38a   : > { %v910_v5 = vpop.permute.xlu0 %909  ;;  %v900_v33 = vpop.permute.xlu1 %899 }
 0x38b   : > { %v911_v4 = vsel %vm605_vm8, %v908_v25, %v910_v5  ;;  %v912_v34 = vsel %vm605_vm8, %v910_v5, %v908_v25  ;;  %v903_v37 = vsel %vm590_vm9, %v900_v33, %v902_v29  ;;  %v904_v40 = vsel %vm590_vm9, %v902_v29, %v900_v33  ;;  %v973_v3 = vpop.permute.xlu2 %972 }
 0x38c   : > { %v913_v7 = vmul.f32 %v912_v34, %v1609_v19  ;;  %v914_v8 = vmul.f32 %v911_v4, %v1611_v21  ;;  %v905_v41 = vmul.f32 %v904_v40, %v1623_v31  ;;  %v906_v42 = vmul.f32 %v903_v37, %v1625_v32  ;;  %v893_v19 = vld [vmem:[%s1926_s10 + $0x10] sm:$0xff]  ;;  %v894_v21 = vld [vmem:[%s1926_s10 + $0x18] sm:$0xff] }
 0x38e   : > { %1011 = vmatpush.msrb.mxu2 %v913_v7  ;;  %1040 = vmatpush.msrb.mxu3 %v914_v8 }
 0x390   : > { %1012 = vmatpush.msrb.mxu2 %v905_v41  ;;  %1041 = vmatpush.msrb.mxu3 %v906_v42 }
 0x391   : > { %1182 = vmatmul.msk.f32.vlgmr.msrb.gmra.mxu2 %vm727_vm10, %v891_v43  ;;  %1186 = vmatmul.msk.f32.vlgmr.msrb.gmra.mxu3 %vm727_vm10, %v891_v43 }
 0x392   : > { %v429_v31 = vpop.permute.xlu1 %428  ;;  %v424_v32 = vpop.permute.xlu0 %423 }
 0x393   : > { %v481_v60 = vadd.f32 %v1638_v44, %v424_v32  ;;  %v510_v61 = vadd.f32 %v1640_v45, %v424_v32  ;;  %v484_v44 = vadd.f32 %v1642_v46, %v429_v31  ;;  %v513_v45 = vadd.f32 %v1644_v47, %v429_v31 }
 0x399   : > { %1183 = vmatmul.msk.f32.gmra.mxu2 %vm727_vm10, %v892_v20  ;;  %1187 = vmatmul.msk.f32.gmra.mxu3 %vm727_vm10, %v892_v20 }
 0x39a   : > { %v968_v55 = vpop.permute.xlu1 %967  ;;  %v439_v2 = vpop.permute.xlu0 %438 }
 0x39b   : > { %v490_v48 = vadd.f32 %v1650_v50, %v439_v2  ;;  %v519_v49 = vadd.f32 %v1652_v51, %v439_v2 }
 0x3a1   : > { %1184 = vmatmul.msk.f32.gmra.mxu2 %vm727_vm10, %v893_v19  ;;  %1188 = vmatmul.msk.f32.gmra.mxu3 %vm727_vm10, %v893_v19 }
 0x3a2   : > { %v978_v24 = vpop.permute.xlu0 %977  ;;  %v983_v17 = vpop.permute.xlu1 %982 }
 0x3a9   : > { %1185 = vmatmul.msk.f32.gmra.mxu2 %vm727_vm10, %v894_v21  ;;  %1189 = vmatmul.msk.f32.gmra.mxu3 %vm727_vm10, %v894_v21 }
 0x414   : > { %v1014_v58 = vpop.f32.mrf.mxu2  ;;  %v1043_v59 = vpop.f32.mrf.mxu3 }
 0x415   : > { %v1015_v62 = vadd.f32 %v1014_v58, %v968_v55  ;;  %v1044_v63 = vadd.f32 %v1043_v59, %v968_v55 }
 0x417   : > { %v1055_v0 = vadd.f32 %v1015_v62, %v481_v60  ;;  %v1056_v1 = vadd.f32 %v1044_v63, %v510_v61 }
 0x419   : > { %1063 = vst [vmem:[%s1865_s0] sm:$0xff] %v1055_v0 }
 0x41a   : > { %1064 = vst [vmem:[%s1865_s0 + $0x8] sm:$0xff] %v1056_v1 }
 0x41c   : > { %v1017_v6 = vpop.f32.mrf.mxu2  ;;  %v1046_v9 = vpop.f32.mrf.mxu3 }
 0x41d   : > { %v1018_v10 = vadd.f32 %v1017_v6, %v973_v3  ;;  %v1047_v11 = vadd.f32 %v1046_v9, %v973_v3 }
 0x41f   : > { %v1057_v12 = vadd.f32 %v1018_v10, %v484_v44  ;;  %v1058_v23 = vadd.f32 %v1047_v11, %v513_v45 }
 0x421   : > { %1065 = vst [vmem:[%s1865_s0 + $0x10] sm:$0xff] %v1057_v12 }
 0x422   : > { %1066 = vst [vmem:[%s1865_s0 + $0x18] sm:$0xff] %v1058_v23 }
 0x424   : > { %v1020_v13 = vpop.f32.mrf.mxu2  ;;  %v1049_v35 = vpop.f32.mrf.mxu3 }
 0x425   : > { %v1021_v46 = vadd.f32 %v1020_v13, %v978_v24  ;;  %v1050_v15 = vadd.f32 %v1049_v35, %v978_v24 }
 0x427   : > { %v1059_v47 = vadd.f32 %v1021_v46, %v487_v14  ;;  %v1060_v16 = vadd.f32 %v1050_v15, %v516_v36 }
 0x429   : > { %1067 = vst [vmem:[%s1865_s0 + $0x20] sm:$0xff] %v1059_v47 }
 0x42a   : > { %1068 = vst [vmem:[%s1865_s0 + $0x28] sm:$0xff] %v1060_v16 }
 0x42c   : > { %v1023_v38 = vpop.f32.mrf.mxu2  ;;  %v1052_v39 = vpop.f32.mrf.mxu3 }
 0x42d   : > { %v1024_v18 = vadd.f32 %v1023_v38, %v983_v17  ;;  %v1053_v22 = vadd.f32 %v1052_v39, %v983_v17 }
 0x42f   : > { %v1061_v25 = vadd.f32 %v1024_v18, %v490_v48  ;;  %v1062_v53 = vadd.f32 %v1053_v22, %v519_v49 }
 0x431   : > { %1069 = vst [vmem:[%s1865_s0 + $0x30] sm:$0xff] %v1061_v25 }
 0x432   : > { %1070 = vst [vmem:[%s1865_s0 + $0x38] sm:$0xff] %v1062_v53 }
 0x433   : > { %1276 = shalt.err (!%p1273_p3)
}
 0x434   : > { %s1322_s29 = smov 256  }
 0x435   : > { %1197 = dma.vmem_to_hbm [thread:$0]  (%p1426_p5), %s1085_s18, 1024, %s1087_s25, %s1072_s26, %s1322_s29, %s1322_s29, %s1952_s20  }
 0x436 PF: > { %p1203_p4 = scmp.ge.s32.totalorder %s1311_s24, 2  ;;  %s1101_s0 = sand.u32 1, %s1299_s21  }
 0x437   : > { %s1102_s2 = scalar_lea.sflag [#allocation3], %s1101_s0 }
 0x438   : > { %p1200_p7 = pnand %p1203_p4, %p1430_p6 }
 0x43a   : > { %p1201_p8 = pneg %p1200_p7 }
 0x43c   : > { %1294 = dma.done.wait (%p1201_p8), %s1102_s2, 1024  }
 0x43d   : > { %1296 = vsyncadd (%p1201_p8), %s1102_s2, 4294966272  ;;  %p22_p9 = scmp.ge.s32.totalorder %s1413_s27, 4   ;;  %s1955_s21 = smov %s1303_s22 }
 0x43e   : > { %s1956_s22 = smov %s1307_s23  ;;  %s1957_s23 = smov %s1424_s30 }
 0x43f   : > { %s1958_s24 = smov %s1413_s27  ;;  %24 = sbr.rel (!%p22_p9) target bundleno = 7 (0x7), region = 111 }
 0x444   :  { %1108 = vsyncpa [#allocation3], 1 }
 0x445   :  { %1110 = vsyncpa [#allocation3 + $0x1], 1 }

</bundles_post_ra>
